<compile_context>
chip_gen: v7x
topology: tpu7x:2x2x1
jax: 0.10.0
libtpu: 0.0.40
codegen_flags: <defaults>
</compile_context>

<pallas_src>
import jax
import jax.numpy as jnp
from jax import lax
from jax.experimental import pallas as pl
from jax.experimental.pallas import tpu as pltpu


def _linear_kernel(x_ref, w_ref, b_ref, o_ref):
    # out[M, N] = x[M, K] @ W[N, K]^T + b[1, N]
    out = lax.dot_general(
        x_ref[...],
        w_ref[...],
        dimension_numbers=(((1,), (1,)), ((), ())),  # contract K with K
        preferred_element_type=jnp.float32,
    )
    o_ref[...] = (out + b_ref[...]).astype(o_ref.dtype)


def linear_pallas(x2d, weight, bias):
    """out = x2d @ weight.T + bias, single-block Pallas TPU kernel.

    x2d:    [M, K]
    weight: [N, K]   (native PyTorch [out_features, in_features] layout)
    bias:   [N]
    """
    M, K = x2d.shape
    N, K2 = weight.shape
    assert K == K2 and bias.shape == (N,)

    bias2d = bias.reshape(1, N)

    cost = pl.CostEstimate(
        flops=2 * M * K * N,
        transcendentals=0,
        bytes_accessed=4 * (M * K + N * K + M * N + N),
    )

    return pl.pallas_call(
        _linear_kernel,
        out_shape=jax.ShapeDtypeStruct((M, N), x2d.dtype),
        grid=(1,),
        in_specs=[
            pl.BlockSpec((M, K), lambda i: (0, 0)),   # x   (whole array)
            pl.BlockSpec((N, K), lambda i: (0, 0)),   # W   (whole array, [N, K])
            pl.BlockSpec((1, N), lambda i: (0, 0)),   # bias
        ],
        out_specs=pl.BlockSpec((M, N), lambda i: (0, 0)),  # lane-dense full-N row
        compiler_params=pltpu.CompilerParams(
            dimension_semantics=("arbitrary",)
        ),
        cost_estimate=cost,
    )(x2d, weight, bias2d)


def net_forward(x, weight, bias):
    """Equivalent of Net.forward: x -> Linear(NMT_embed_size, 768)(x).

    x:      [..., E]
    weight: [768, E]  (PyTorch layout [out_features, in_features], used as-is)
    bias:   [768]
    """
    lead_shape = x.shape[:-1]
    E = x.shape[-1]
    x2d = x.reshape(-1, E)
    out2d = linear_pallas(x2d, weight, bias)
    return out2d.reshape(*lead_shape, weight.shape[0])


if __name__ == "__main__":
    # Small, deterministic shapes consistent with the module.
    B, S, E = 2, 8, 256          # NMT_embed_size = 256
    OUT = 768

    key = jax.random.PRNGKey(0)
    kx, kw, kb = jax.random.split(key, 3)

    x = jax.random.normal(kx, (B, S, E), dtype=jnp.float32)
    # Deterministic parameter init (synthetic; not a checkpoint load).
    weight = jax.random.normal(kw, (OUT, E), dtype=jnp.float32) * (1.0 / E**0.5)
    bias = jax.random.normal(kb, (OUT,), dtype=jnp.float32) * 0.01

    out = net_forward(x, weight, bias)
    out = jax.block_until_ready(out)

    # Reference check against plain JAX.
    ref = x @ weight.T + bias
    assert out.shape == (B, S, OUT)
    assert jnp.allclose(out, ref, atol=1e-4, rtol=1e-4)

    print("KERNEL_OK")
</pallas_src>

<mosaic_0001>
module attributes {stable_mosaic.version = 11 : i64} {
  func.func @_linear_kernel(%arg0: i32, %arg1: memref<16x256xf32, #tpu.memory_space<vmem>>, %arg2: memref<768x256xf32, #tpu.memory_space<vmem>>, %arg3: memref<1x768xf32, #tpu.memory_space<vmem>>, %arg4: memref<16x768xf32, #tpu.memory_space<vmem>>) attributes {dimension_semantics = [#tpu.dimension_semantics<arbitrary>], iteration_bounds = array<i64: 1>, scalar_prefetch = 0 : i64, scratch_operands = 0 : i64, tpu.core_type = #tpu.core_type<tc>, window_params = [{pipeline_mode = #tpu.pipeline_mode<synchronous>, transform_indices = @transform_0, window_bounds = array<i64: 16, 256>}, {pipeline_mode = #tpu.pipeline_mode<synchronous>, transform_indices = @transform_1, window_bounds = array<i64: 768, 256>}, {pipeline_mode = #tpu.pipeline_mode<synchronous>, transform_indices = @transform_2, window_bounds = array<i64: 1, 768>}, {pipeline_mode = #tpu.pipeline_mode<synchronous>, transform_indices = @transform_3, window_bounds = array<i64: 16, 768>}]} {
    %c0 = arith.constant 0 : index
    %c0_0 = arith.constant 0 : index
    %0 = vector.load %arg1[%c0, %c0_0] : memref<16x256xf32, #tpu.memory_space<vmem>>, vector<16x256xf32>
    %c0_1 = arith.constant 0 : index
    %c0_2 = arith.constant 0 : index
    %1 = vector.load %arg2[%c0_1, %c0_2] : memref<768x256xf32, #tpu.memory_space<vmem>>, vector<768x256xf32>
    %cst = arith.constant dense<0.000000e+00> : vector<16x768xf32>
    %2 = tpu.matmul %0, %1, %cst {dimension_numbers = #tpu.dot_dimension_numbers<[1], [1], [0], [0], [0, 0, 1, 0], [], []>} : vector<16x256xf32>, vector<768x256xf32>, vector<16x768xf32> -> vector<16x768xf32>
    %c0_3 = arith.constant 0 : index
    %c0_4 = arith.constant 0 : index
    %3 = vector.load %arg3[%c0_3, %c0_4] : memref<1x768xf32, #tpu.memory_space<vmem>>, vector<1x768xf32>
    %4 = vector.broadcast %3 : vector<1x768xf32> to vector<16x768xf32>
    %5 = arith.addf %2, %4 : vector<16x768xf32>
    %c0_5 = arith.constant 0 : index
    %c0_6 = arith.constant 0 : index
    %6 = vector.load %arg4[%c0_5, %c0_6] : memref<16x768xf32, #tpu.memory_space<vmem>>, vector<16x768xf32>
    tpu.vector_store %arg4[%c0_5, %c0_6], %5 {strides = array<i32>} : memref<16x768xf32, #tpu.memory_space<vmem>>, vector<16x768xf32>,
    return
  }
  func.func @transform_0(%arg0: i32) -> (i32, i32) {
    %c0_i32 = arith.constant 0 : i32
    %c0_i32_0 = arith.constant 0 : i32
    %c0_i32_1 = arith.constant 0 : i32
    return %c0_i32, %c0_i32_0 : i32, i32
  }
  func.func @transform_1(%arg0: i32) -> (i32, i32) {
    %c0_i32 = arith.constant 0 : i32
    %c0_i32_0 = arith.constant 0 : i32
    %c0_i32_1 = arith.constant 0 : i32
    return %c0_i32, %c0_i32_0 : i32, i32
  }
  func.func @transform_2(%arg0: i32) -> (i32, i32) {
    %c0_i32 = arith.constant 0 : i32
    %c0_i32_0 = arith.constant 0 : i32
    %c0_i32_1 = arith.constant 0 : i32
    return %c0_i32, %c0_i32_0 : i32, i32
  }
  func.func @transform_3(%arg0: i32) -> (i32, i32) {
    %c0_i32 = arith.constant 0 : i32
    %c0_i32_0 = arith.constant 0 : i32
    %c0_i32_1 = arith.constant 0 : i32
    return %c0_i32, %c0_i32_0 : i32, i32
  }
}

</mosaic_0001>

<bundles_post_ra>
// kernel: tpu_custom_call.1
= control target key start
LH: loop header
LB: loop body
LE: loop exit
PB: predicated region body
PF: predicated region fallthrough
CT: control target
= control target key end

     0   :  { %8 = vsyncpa [#allocation3], 0  ;;  %s916_s0 = inlined_call_operand.hbm [shape: f32[16,256], index: 0, kind: input, shape index: {}]   ;;  %s917_s1 = inlined_call_operand.hbm [shape: f32[768,256], index: 1, kind: input, shape index: {}]   ;;  %s918_s2 = inlined_call_operand.vmem [shape: f32[1,768], index: 2, kind: input, shape index: {}]   ;;  %s919_s3 = inlined_call_operand.hbm [shape: f32[16,768], index: 3, kind: output, shape index: {}]  }
   0x1   :  { %9 = vsyncpa [#allocation6], 0 }
   0x2   :  { %10 = vsyncpa [#allocation4], 0  ;;  %s835_s12 = smov [#allocation2]   ;;  %s763_s16 = scalar_lea.hbm %s916_s0, 512 }
   0x3   :  { %s16_s13 = sshll.u32 %s835_s12, 4  ;;  %p764_p0 = scmp.ne.s32.totalorder %s916_s0, %s763_s16  ;;  %s17_s13 = int_to_ptr.vmem [resolvable:$true] %s16_s13 }
   0x4   :  { %p767_p1 = scmp.lt.u32.totalorder %s763_s16, %s916_s0 }
   0x6   :  { %p769_p2 = pnand %p767_p1, %p764_p0 }
   0x8   :  { %772 = shalt.err (!%p769_p2)
}
   0x9   :  { %s773_s21 = scalar_lea.vmem %s17_s13, 512  ;;  %p778_p4 = scmp.lt.s32.totalorder %s17_s13, %s17_s13 }
   0xa   :  { %p774_p3 = scmp.ne.s32.totalorder %s17_s13, %s773_s21  ;;  %p779_p5 = scmp.lt.s32.totalorder %s773_s21, %s773_s21 }
   0xc   :  { %p780_p6 = por %p779_p5, %p778_p4 }
   0xe   :  { %p781_p7 = pnand %p780_p6, %p774_p3 }
  0x10   :  { %784 = shalt.err (!%p781_p7)
}
  0x11   :  { %s836_s22 = smov 256   ;;  %s837_s23 = smov 16  }
  0x12   :  { %22 = dma.hbm_to_vmem [thread:$0]  %s916_s0, 512, %s17_s13, [#allocation3], %s836_s22, %s836_s22, %s837_s23  }
  0x13   :  { %s838_s26 = smov [#allocation5]   ;;  %s785_s30 = scalar_lea.hbm %s917_s1, 24576 }
  0x14   :  { %s28_s27 = sshll.u32 %s838_s26, 4  ;;  %p786_p8 = scmp.ne.s32.totalorder %s917_s1, %s785_s30  ;;  %s29_s27 = int_to_ptr.vmem [resolvable:$true] %s28_s27 }
  0x15   :  { %p789_p9 = scmp.lt.u32.totalorder %s785_s30, %s917_s1 }
  0x17   :  { %p791_p10 = pnand %p789_p9, %p786_p8 }
  0x19   :  { %794 = shalt.err (!%p791_p10)
}
  0x1a   :  { %s795_s8 = scalar_lea.vmem %s29_s27, 24576  ;;  %p800_p12 = scmp.lt.s32.totalorder %s29_s27, %s29_s27 }
  0x1b   :  { %p796_p11 = scmp.ne.s32.totalorder %s29_s27, %s795_s8  ;;  %p801_p13 = scmp.lt.s32.totalorder %s795_s8, %s795_s8 }
  0x1d   :  { %p802_p0 = por %p801_p13, %p800_p12 }
  0x1f   :  { %p803_p1 = pnand %p802_p0, %p796_p11 }
  0x21   :  { %806 = shalt.err (!%p803_p1)
}
  0x22   :  { %34 = dma.hbm_to_vmem [thread:$0]  %s917_s1, 24576, %s29_s27, [#allocation6], %s836_s22, %s836_s22, %s837_s23  }
  0x23   :  { %829 = dma.done.wait [#allocation3], 512  }
  0x24   :  { %830 = vsyncadd [#allocation3], 4294966784 }
  0x25   :  { %831 = dma.done.wait [#allocation6], 24576  }
  0x26   :  { %832 = vsyncadd [#allocation6], 4294942720  ;;  %v48_v0 = vld [vmem:[#allocation5 + $0x8] sm:$0xff]  ;;  %v50_v1 = vld [vmem:[#allocation5 + $0x18] sm:$0xff] }
  0x27   :  { %v112_v2 = vld [vmem:[#allocation5 + $0x208] sm:$0xff]  ;;  %v532_v3 = vpack.c.bf16 %v50_v1, %v48_v0  ;;  %v114_v4 = vld [vmem:[#allocation5 + $0x218] sm:$0xff]  ;;  %v47_v5 = vld [vmem:[#allocation5] sm:$0xff] }
  0x28   :  { %v49_v6 = vld [vmem:[#allocation5 + $0x10] sm:$0xff]  ;;  %v596_v7 = vpack.c.bf16 %v114_v4, %v112_v2  ;;  %v111_v9 = vld [vmem:[#allocation5 + $0x200] sm:$0xff]  ;;  %v52_v11 = vld [vmem:[#allocation5 + $0x28] sm:$0xff] }
  0x29   :  { %v534_v8 = vpack.c.bf16 %v49_v6, %v47_v5  ;;  %v113_v10 = vld [vmem:[#allocation5 + $0x210] sm:$0xff]  ;;  %533 = vmatprep.subr.bf16.mxu0 %v532_v3  ;;  %v54_v13 = vld [vmem:[#allocation5 + $0x38] sm:$0xff]  ;;  %v116_v14 = vld [vmem:[#allocation5 + $0x228] sm:$0xff] }
  0x2a   :  { %v598_v12 = vpack.c.bf16 %v113_v10, %v111_v9  ;;  %v118_v15 = vld [vmem:[#allocation5 + $0x238] sm:$0xff]  ;;  %597 = vmatprep.subr.bf16.mxu1 %v596_v7  ;;  %v536_v16 = vpack.c.bf16 %v54_v13, %v52_v11  ;;  %v51_v18 = vld [vmem:[#allocation5 + $0x20] sm:$0xff]  ;;  %v53_v19 = vld [vmem:[#allocation5 + $0x30] sm:$0xff] }
  0x2b   :  { %535 = vmatpush1.bf16.xpose.msra.mxu0 %v534_v8  ;;  %v600_v17 = vpack.c.bf16 %v118_v15, %v116_v14  ;;  %v115_v20 = vld [vmem:[#allocation5 + $0x220] sm:$0xff]  ;;  %v117_v21 = vld [vmem:[#allocation5 + $0x230] sm:$0xff]  ;;  %v56_v22 = vld [vmem:[#allocation5 + $0x48] sm:$0xff]  ;;  %v538_v26 = vpack.c.bf16 %v53_v19, %v51_v18 }
  0x2c   :  { %599 = vmatpush1.bf16.xpose.msra.mxu1 %v598_v12  ;;  %537 = vmatprep.subr.bf16.mxu0 %v536_v16  ;;  %v58_v23 = vld [vmem:[#allocation5 + $0x58] sm:$0xff]  ;;  %v120_v24 = vld [vmem:[#allocation5 + $0x248] sm:$0xff]  ;;  %v602_v27 = vpack.c.bf16 %v117_v21, %v115_v20  ;;  %v55_v30 = vld [vmem:[#allocation5 + $0x40] sm:$0xff] }
  0x2d   :  { %601 = vmatprep.subr.bf16.mxu1 %v600_v17  ;;  %v122_v25 = vld [vmem:[#allocation5 + $0x258] sm:$0xff]  ;;  %v540_v28 = vpack.c.bf16 %v58_v23, %v56_v22  ;;  %v57_v31 = vld [vmem:[#allocation5 + $0x50] sm:$0xff]  ;;  %v119_v32 = vld [vmem:[#allocation5 + $0x240] sm:$0xff] }
  0x2e   :  { %v604_v29 = vpack.c.bf16 %v122_v25, %v120_v24  ;;  %v121_v33 = vld [vmem:[#allocation5 + $0x250] sm:$0xff]  ;;  %v60_v34 = vld [vmem:[#allocation5 + $0x68] sm:$0xff]  ;;  %v62_v35 = vld [vmem:[#allocation5 + $0x78] sm:$0xff]  ;;  %v542_v38 = vpack.c.bf16 %v57_v31, %v55_v30 }
  0x2f   :  { %v124_v36 = vld [vmem:[#allocation5 + $0x268] sm:$0xff]  ;;  %v126_v37 = vld [vmem:[#allocation5 + $0x278] sm:$0xff]  ;;  %v606_v39 = vpack.c.bf16 %v121_v33, %v119_v32  ;;  %v544_v40 = vpack.c.bf16 %v62_v35, %v60_v34  ;;  %v59_v42 = vld [vmem:[#allocation5 + $0x60] sm:$0xff] }
  0x30   :  { %v608_v41 = vpack.c.bf16 %v126_v37, %v124_v36  ;;  %v61_v43 = vld [vmem:[#allocation5 + $0x70] sm:$0xff]  ;;  %v123_v44 = vld [vmem:[#allocation5 + $0x260] sm:$0xff]  ;;  %v64_v46 = vld [vmem:[#allocation5 + $0x88] sm:$0xff] }
  0x31   :  { %v125_v45 = vld [vmem:[#allocation5 + $0x270] sm:$0xff]  ;;  %v66_v47 = vld [vmem:[#allocation5 + $0x98] sm:$0xff]  ;;  %v128_v48 = vld [vmem:[#allocation5 + $0x288] sm:$0xff]  ;;  %v546_v50 = vpack.c.bf16 %v61_v43, %v59_v42 }
  0x32   :  { %v130_v49 = vld [vmem:[#allocation5 + $0x298] sm:$0xff]  ;;  %v610_v51 = vpack.c.bf16 %v125_v45, %v123_v44  ;;  %v548_v52 = vpack.c.bf16 %v66_v47, %v64_v46  ;;  %v63_v54 = vld [vmem:[#allocation5 + $0x80] sm:$0xff]  ;;  %v65_v55 = vld [vmem:[#allocation5 + $0x90] sm:$0xff] }
  0x33   :  { %539 = vmatpush1.bf16.xpose.msra.mxu0 %v538_v26  ;;  %v612_v53 = vpack.c.bf16 %v130_v49, %v128_v48  ;;  %v127_v56 = vld [vmem:[#allocation5 + $0x280] sm:$0xff]  ;;  %v129_v57 = vld [vmem:[#allocation5 + $0x290] sm:$0xff]  ;;  %v68_v58 = vld [vmem:[#allocation5 + $0xa8] sm:$0xff]  ;;  %v550_v62 = vpack.c.bf16 %v65_v55, %v63_v54 }
  0x34   :  { %603 = vmatpush1.bf16.xpose.msra.mxu1 %v602_v27  ;;  %541 = vmatprep.subr.bf16.mxu0 %v540_v28  ;;  %v70_v59 = vld [vmem:[#allocation5 + $0xb8] sm:$0xff]  ;;  %v132_v60 = vld [vmem:[#allocation5 + $0x2a8] sm:$0xff]  ;;  %v614_v63 = vpack.c.bf16 %v129_v57, %v127_v56  ;;  %v67_v2 = vld [vmem:[#allocation5 + $0xa0] sm:$0xff] }
  0x35   :  { %605 = vmatprep.subr.bf16.mxu1 %v604_v29  ;;  %v134_v61 = vld [vmem:[#allocation5 + $0x2b8] sm:$0xff]  ;;  %v552_v0 = vpack.c.bf16 %v70_v59, %v68_v58  ;;  %v69_v3 = vld [vmem:[#allocation5 + $0xb0] sm:$0xff]  ;;  %v131_v4 = vld [vmem:[#allocation5 + $0x2a0] sm:$0xff] }
  0x36   :  { %v616_v1 = vpack.c.bf16 %v134_v61, %v132_v60  ;;  %v133_v5 = vld [vmem:[#allocation5 + $0x2b0] sm:$0xff]  ;;  %v72_v6 = vld [vmem:[#allocation5 + $0xc8] sm:$0xff]  ;;  %v74_v7 = vld [vmem:[#allocation5 + $0xd8] sm:$0xff]  ;;  %v554_v10 = vpack.c.bf16 %v69_v3, %v67_v2 }
  0x37   :  { %v136_v8 = vld [vmem:[#allocation5 + $0x2c8] sm:$0xff]  ;;  %v138_v9 = vld [vmem:[#allocation5 + $0x2d8] sm:$0xff]  ;;  %v618_v11 = vpack.c.bf16 %v133_v5, %v131_v4  ;;  %v556_v12 = vpack.c.bf16 %v74_v7, %v72_v6  ;;  %v71_v15 = vld [vmem:[#allocation5 + $0xc0] sm:$0xff] }
  0x38   :  { %v620_v13 = vpack.c.bf16 %v138_v9, %v136_v8  ;;  %v886_v14 = vld [vmem:[#allocation2 + $0x8] sm:$0xff]  ;;  %v73_v16 = vld [vmem:[#allocation5 + $0xd0] sm:$0xff]  ;;  %v135_v17 = vld [vmem:[#allocation5 + $0x2c0] sm:$0xff] }
  0x39   :  { %335 = vmatprep.mubr.f32.mxu0 %v886_v14  ;;  %412 = vmatprep.mubr.f32.mxu1 %v886_v14  ;;  %v137_v18 = vld [vmem:[#allocation5 + $0x2d0] sm:$0xff]  ;;  %v76_v19 = vld [vmem:[#allocation5 + $0xe8] sm:$0xff]  ;;  %v78_v20 = vld [vmem:[#allocation5 + $0xf8] sm:$0xff]  ;;  %v558_v23 = vpack.c.bf16 %v73_v16, %v71_v15 }
  0x3a   :  { %v140_v21 = vld [vmem:[#allocation5 + $0x2e8] sm:$0xff]  ;;  %v142_v22 = vld [vmem:[#allocation5 + $0x2f8] sm:$0xff]  ;;  %v622_v24 = vpack.c.bf16 %v137_v18, %v135_v17  ;;  %v560_v25 = vpack.c.bf16 %v78_v20, %v76_v19  ;;  %v75_v27 = vld [vmem:[#allocation5 + $0xe0] sm:$0xff] }
  0x3b   :  { %543 = vmatpush1.bf16.xpose.msra.mxu0 %v542_v38  ;;  %v624_v26 = vpack.c.bf16 %v142_v22, %v140_v21  ;;  %v77_v28 = vld [vmem:[#allocation5 + $0xf0] sm:$0xff]  ;;  %v139_v29 = vld [vmem:[#allocation5 + $0x2e0] sm:$0xff]  ;;  %v80_v31 = vld [vmem:[#allocation5 + $0x108] sm:$0xff] }
  0x3c   :  { %607 = vmatpush1.bf16.xpose.msra.mxu1 %v606_v39  ;;  %545 = vmatprep.subr.bf16.mxu0 %v544_v40  ;;  %v141_v30 = vld [vmem:[#allocation5 + $0x2f0] sm:$0xff]  ;;  %v82_v32 = vld [vmem:[#allocation5 + $0x118] sm:$0xff]  ;;  %v144_v33 = vld [vmem:[#allocation5 + $0x308] sm:$0xff]  ;;  %v562_v35 = vpack.c.bf16 %v77_v28, %v75_v27 }
  0x3d   :  { %609 = vmatprep.subr.bf16.mxu1 %v608_v41  ;;  %v146_v34 = vld [vmem:[#allocation5 + $0x318] sm:$0xff]  ;;  %v626_v36 = vpack.c.bf16 %v141_v30, %v139_v29  ;;  %v564_v37 = vpack.c.bf16 %v82_v32, %v80_v31  ;;  %v79_v39 = vld [vmem:[#allocation5 + $0x100] sm:$0xff]  ;;  %v81_v40 = vld [vmem:[#allocation5 + $0x110] sm:$0xff] }
  0x3e   :  { %v628_v38 = vpack.c.bf16 %v146_v34, %v144_v33  ;;  %v143_v41 = vld [vmem:[#allocation5 + $0x300] sm:$0xff]  ;;  %v145_v42 = vld [vmem:[#allocation5 + $0x310] sm:$0xff]  ;;  %v84_v43 = vld [vmem:[#allocation5 + $0x128] sm:$0xff]  ;;  %v566_v47 = vpack.c.bf16 %v81_v40, %v79_v39 }
  0x3f   :  { %v86_v44 = vld [vmem:[#allocation5 + $0x138] sm:$0xff]  ;;  %v148_v45 = vld [vmem:[#allocation5 + $0x328] sm:$0xff]  ;;  %v630_v48 = vpack.c.bf16 %v145_v42, %v143_v41  ;;  %v149_v54 = vld [vmem:[#allocation5 + $0x330] sm:$0xff] }
  0x40   :  { %v150_v46 = vld [vmem:[#allocation5 + $0x338] sm:$0xff]  ;;  %v568_v49 = vpack.c.bf16 %v86_v44, %v84_v43  ;;  %v88_v55 = vld [vmem:[#allocation5 + $0x148] sm:$0xff]  ;;  %v153_v2 = vld [vmem:[#allocation5 + $0x350] sm:$0xff] }
  0x41   :  { %v90_v56 = vld [vmem:[#allocation5 + $0x158] sm:$0xff]  ;;  %v152_v57 = vld [vmem:[#allocation5 + $0x348] sm:$0xff]  ;;  %v157_v15 = vld [vmem:[#allocation5 + $0x370] sm:$0xff] }
  0x42   :  { %v154_v58 = vld [vmem:[#allocation5 + $0x358] sm:$0xff]  ;;  %v572_v61 = vpack.c.bf16 %v90_v56, %v88_v55  ;;  %v92_v3 = vld [vmem:[#allocation5 + $0x168] sm:$0xff]  ;;  %v161_v27 = vld [vmem:[#allocation5 + $0x390] sm:$0xff] }
  0x43   :  { %547 = vmatpush1.bf16.xpose.msra.mxu0 %v546_v50  ;;  %v632_v50 = vpack.c.bf16 %v150_v46, %v148_v45  ;;  %v94_v4 = vld [vmem:[#allocation5 + $0x178] sm:$0xff]  ;;  %v156_v5 = vld [vmem:[#allocation5 + $0x368] sm:$0xff]  ;;  %v165_v39 = vld [vmem:[#allocation5 + $0x3b0] sm:$0xff] }
  0x44   :  { %611 = vmatpush1.bf16.xpose.msra.mxu1 %v610_v51  ;;  %549 = vmatprep.subr.bf16.mxu0 %v548_v52  ;;  %v83_v51 = vld [vmem:[#allocation5 + $0x120] sm:$0xff]  ;;  %v85_v52 = vld [vmem:[#allocation5 + $0x130] sm:$0xff]  ;;  %v158_v6 = vld [vmem:[#allocation5 + $0x378] sm:$0xff]  ;;  %v576_v9 = vpack.c.bf16 %v94_v4, %v92_v3 }
  0x45   :  { %613 = vmatprep.subr.bf16.mxu1 %v612_v53  ;;  %v147_v53 = vld [vmem:[#allocation5 + $0x320] sm:$0xff]  ;;  %v570_v59 = vpack.c.bf16 %v85_v52, %v83_v51  ;;  %v96_v16 = vld [vmem:[#allocation5 + $0x188] sm:$0xff]  ;;  %v98_v17 = vld [vmem:[#allocation5 + $0x198] sm:$0xff] }
  0x46   :  { %v634_v60 = vpack.c.bf16 %v149_v54, %v147_v53  ;;  %v160_v18 = vld [vmem:[#allocation5 + $0x388] sm:$0xff]  ;;  %v162_v19 = vld [vmem:[#allocation5 + $0x398] sm:$0xff]  ;;  %v580_v22 = vpack.c.bf16 %v98_v17, %v96_v16  ;;  %v169_v51 = vld [vmem:[#allocation5 + $0x3d0] sm:$0xff] }
  0x47   :  { %v100_v28 = vld [vmem:[#allocation5 + $0x1a8] sm:$0xff]  ;;  %v102_v29 = vld [vmem:[#allocation5 + $0x1b8] sm:$0xff]  ;;  %v181_v16 = vld [vmem:[#allocation5 + $0x430] sm:$0xff] }
  0x48   :  { %v164_v30 = vld [vmem:[#allocation5 + $0x3a8] sm:$0xff]  ;;  %v166_v31 = vld [vmem:[#allocation5 + $0x3b8] sm:$0xff]  ;;  %v584_v34 = vpack.c.bf16 %v102_v29, %v100_v28  ;;  %v189_v28 = vld [vmem:[#allocation5 + $0x470] sm:$0xff] }
  0x49   :  { %v104_v40 = vld [vmem:[#allocation5 + $0x1c8] sm:$0xff]  ;;  %v106_v41 = vld [vmem:[#allocation5 + $0x1d8] sm:$0xff] }
  0x4a   :  { %v168_v42 = vld [vmem:[#allocation5 + $0x3c8] sm:$0xff]  ;;  %v170_v43 = vld [vmem:[#allocation5 + $0x3d8] sm:$0xff]  ;;  %v588_v46 = vpack.c.bf16 %v106_v41, %v104_v40 }
  0x4b   :  { %551 = vmatpush1.bf16.xpose.msra.mxu0 %v550_v62  ;;  %v636_v62 = vpack.c.bf16 %v154_v58, %v152_v57  ;;  %v108_v52 = vld [vmem:[#allocation5 + $0x1e8] sm:$0xff]  ;;  %v110_v53 = vld [vmem:[#allocation5 + $0x1f8] sm:$0xff] }
  0x4c   :  { %615 = vmatpush1.bf16.xpose.msra.mxu1 %v614_v63  ;;  %553 = vmatprep.subr.bf16.mxu0 %v552_v0  ;;  %v87_v63 = vld [vmem:[#allocation5 + $0x140] sm:$0xff]  ;;  %v89_v0 = vld [vmem:[#allocation5 + $0x150] sm:$0xff]  ;;  %v172_v54 = vld [vmem:[#allocation5 + $0x3e8] sm:$0xff]  ;;  %v592_v58 = vpack.c.bf16 %v110_v53, %v108_v52 }
  0x4d   :  { %617 = vmatprep.subr.bf16.mxu1 %v616_v1  ;;  %v151_v1 = vld [vmem:[#allocation5 + $0x340] sm:$0xff]  ;;  %v574_v7 = vpack.c.bf16 %v89_v0, %v87_v63  ;;  %v174_v55 = vld [vmem:[#allocation5 + $0x3f8] sm:$0xff]  ;;  %v173_v63 = vld [vmem:[#allocation5 + $0x3f0] sm:$0xff] }
  0x4e   :  { %v638_v8 = vpack.c.bf16 %v153_v2, %v151_v1  ;;  %v176_v0 = vld [vmem:[#allocation5 + $0x408] sm:$0xff]  ;;  %v178_v1 = vld [vmem:[#allocation5 + $0x418] sm:$0xff] }
  0x4f   :  { %v660_v4 = vpack.c.bf16 %v178_v1, %v176_v0  ;;  %v184_v17 = vld [vmem:[#allocation5 + $0x448] sm:$0xff]  ;;  %v202_v41 = vld [vmem:[#allocation5 + $0x4d8] sm:$0xff] }
  0x50   :  { %v192_v29 = vld [vmem:[#allocation5 + $0x488] sm:$0xff]  ;;  %v210_v53 = vld [vmem:[#allocation5 + $0x518] sm:$0xff] }
  0x51   :  { %v200_v40 = vld [vmem:[#allocation5 + $0x4c8] sm:$0xff]  ;;  %v218_v1 = vld [vmem:[#allocation5 + $0x558] sm:$0xff] }
  0x52   :  { %v208_v52 = vld [vmem:[#allocation5 + $0x508] sm:$0xff] }
  0x53   :  { %555 = vmatpush1.bf16.xpose.msra.mxu0 %v554_v10  ;;  %v640_v10 = vpack.c.bf16 %v158_v6, %v156_v5  ;;  %v175_v5 = vld [vmem:[#allocation5 + $0x400] sm:$0xff]  ;;  %v177_v6 = vld [vmem:[#allocation5 + $0x410] sm:$0xff]  ;;  %v216_v0 = vld [vmem:[#allocation5 + $0x548] sm:$0xff] }
  0x54   :  { %619 = vmatpush1.bf16.xpose.msra.mxu1 %v618_v11  ;;  %557 = vmatprep.subr.bf16.mxu0 %v556_v12  ;;  %v91_v11 = vld [vmem:[#allocation5 + $0x160] sm:$0xff]  ;;  %v93_v12 = vld [vmem:[#allocation5 + $0x170] sm:$0xff] }
  0x55   :  { %621 = vmatprep.subr.bf16.mxu1 %v620_v13  ;;  %v155_v13 = vld [vmem:[#allocation5 + $0x360] sm:$0xff]  ;;  %v578_v20 = vpack.c.bf16 %v93_v12, %v91_v11  ;;  %v46_v12 = vld [vmem:[#allocation2 + $0x18] sm:$0xff] }
  0x56   :  { %v642_v21 = vpack.c.bf16 %v157_v15, %v155_v13  ;;  %v894_v13 = vld [vmem:[#allocation2 + $0x10] sm:$0xff]  ;;  %v179_v15 = vld [vmem:[#allocation5 + $0x420] sm:$0xff] }
  0x5b   :  { %559 = vmatpush1.bf16.xpose.msra.mxu0 %v558_v23  ;;  %v644_v23 = vpack.c.bf16 %v162_v19, %v160_v18  ;;  %v186_v18 = vld [vmem:[#allocation5 + $0x458] sm:$0xff]  ;;  %v666_v19 = vpack.c.bf16 %v181_v16, %v179_v15  ;;  %v224_v15 = vld [vmem:[#allocation5 + $0x588] sm:$0xff] }
  0x5c   :  { %623 = vmatpush1.bf16.xpose.msra.mxu1 %v622_v24  ;;  %561 = vmatprep.subr.bf16.mxu0 %v560_v25  ;;  %v95_v24 = vld [vmem:[#allocation5 + $0x180] sm:$0xff]  ;;  %v97_v25 = vld [vmem:[#allocation5 + $0x190] sm:$0xff]  ;;  %v226_v16 = vld [vmem:[#allocation5 + $0x598] sm:$0xff] }
  0x5d   :  { %625 = vmatprep.subr.bf16.mxu1 %v624_v26  ;;  %v159_v26 = vld [vmem:[#allocation5 + $0x380] sm:$0xff]  ;;  %v582_v32 = vpack.c.bf16 %v97_v25, %v95_v24  ;;  %v190_v24 = vld [vmem:[#allocation5 + $0x478] sm:$0xff] }
  0x5e   :  { %v646_v33 = vpack.c.bf16 %v161_v27, %v159_v26  ;;  %v187_v27 = vld [vmem:[#allocation5 + $0x460] sm:$0xff] }
  0x63   :  { %563 = vmatpush1.bf16.xpose.msra.mxu0 %v562_v35  ;;  %v648_v35 = vpack.c.bf16 %v166_v31, %v164_v30  ;;  %v674_v30 = vpack.c.bf16 %v189_v28, %v187_v27  ;;  %v232_v27 = vld [vmem:[#allocation5 + $0x5c8] sm:$0xff]  ;;  %v234_v28 = vld [vmem:[#allocation5 + $0x5d8] sm:$0xff] }
  0x64   :  { %627 = vmatpush1.bf16.xpose.msra.mxu1 %v626_v36  ;;  %565 = vmatprep.subr.bf16.mxu0 %v564_v37  ;;  %v99_v36 = vld [vmem:[#allocation5 + $0x1a0] sm:$0xff]  ;;  %v101_v37 = vld [vmem:[#allocation5 + $0x1b0] sm:$0xff] }
  0x65   :  { %629 = vmatprep.subr.bf16.mxu1 %v628_v38  ;;  %v163_v38 = vld [vmem:[#allocation5 + $0x3a0] sm:$0xff]  ;;  %v586_v44 = vpack.c.bf16 %v101_v37, %v99_v36 }
  0x66   :  { %v650_v45 = vpack.c.bf16 %v165_v39, %v163_v38  ;;  %v195_v38 = vld [vmem:[#allocation5 + $0x4a0] sm:$0xff]  ;;  %v197_v39 = vld [vmem:[#allocation5 + $0x4b0] sm:$0xff] }
  0x6b   :  { %567 = vmatpush1.bf16.xpose.msra.mxu0 %v566_v47  ;;  %v652_v47 = vpack.c.bf16 %v170_v43, %v168_v42  ;;  %v682_v42 = vpack.c.bf16 %v197_v39, %v195_v38  ;;  %v684_v43 = vpack.c.bf16 %v202_v41, %v200_v40  ;;  %v241_v39 = vlaneseq }
  0x6c   :  { %631 = vmatpush1.bf16.xpose.msra.mxu1 %v630_v48  ;;  %569 = vmatprep.subr.bf16.mxu0 %v568_v49  ;;  %v103_v48 = vld [vmem:[#allocation5 + $0x1c0] sm:$0xff]  ;;  %v105_v49 = vld [vmem:[#allocation5 + $0x1d0] sm:$0xff] }
  0x6d   :  { %633 = vmatprep.subr.bf16.mxu1 %v632_v50  ;;  %v167_v50 = vld [vmem:[#allocation5 + $0x3c0] sm:$0xff]  ;;  %v590_v56 = vpack.c.bf16 %v105_v49, %v103_v48  ;;  %v242_v40 = vshrl.u32 %v241_v39, 7 }
  0x6e   :  { %v654_v57 = vpack.c.bf16 %v169_v51, %v167_v50  ;;  %v203_v50 = vld [vmem:[#allocation5 + $0x4e0] sm:$0xff]  ;;  %v205_v51 = vld [vmem:[#allocation5 + $0x4f0] sm:$0xff] }
  0x6f   :  { %v243_v41 = vsub.s32 0, %v242_v40 }
  0x73   :  { %571 = vmatpush1.bf16.xpose.msra.mxu0 %v570_v59  ;;  %v656_v59 = vpack.c.bf16 %v174_v55, %v172_v54  ;;  %v690_v54 = vpack.c.bf16 %v205_v51, %v203_v50  ;;  %v692_v55 = vpack.c.bf16 %v210_v53, %v208_v52 }
  0x74   :  { %635 = vmatpush1.bf16.xpose.msra.mxu1 %v634_v60  ;;  %573 = vmatprep.subr.bf16.mxu0 %v572_v61  ;;  %v107_v60 = vld [vmem:[#allocation5 + $0x1e0] sm:$0xff]  ;;  %v109_v61 = vld [vmem:[#allocation5 + $0x1f0] sm:$0xff] }
  0x75   :  { %637 = vmatprep.subr.bf16.mxu1 %v636_v62  ;;  %v171_v62 = vld [vmem:[#allocation5 + $0x3e0] sm:$0xff]  ;;  %v594_v2 = vpack.c.bf16 %v109_v61, %v107_v60 }
  0x76   :  { %v658_v3 = vpack.c.bf16 %v173_v63, %v171_v62  ;;  %v211_v62 = vld [vmem:[#allocation5 + $0x520] sm:$0xff]  ;;  %v213_v63 = vld [vmem:[#allocation5 + $0x530] sm:$0xff] }
  0x7b   :  { %575 = vmatpush1.bf16.xpose.msra.mxu0 %v574_v7  ;;  %v180_v7 = vld [vmem:[#allocation5 + $0x428] sm:$0xff] }
  0x7c   :  { %639 = vmatpush1.bf16.xpose.msra.mxu1 %v638_v8  ;;  %577 = vmatprep.subr.bf16.mxu0 %v576_v9  ;;  %v182_v8 = vld [vmem:[#allocation5 + $0x438] sm:$0xff]  ;;  %v890_v9 = vld [vmem:[#allocation2] sm:$0xff] }
  0x7d   :  { %641 = vmatprep.subr.bf16.mxu1 %v640_v10  ;;  %v662_v10 = vpack.c.bf16 %v177_v6, %v175_v5  ;;  %v664_v11 = vpack.c.bf16 %v182_v8, %v180_v7  ;;  %v217_v5 = vld [vmem:[#allocation5 + $0x550] sm:$0xff]  ;;  %v220_v6 = vld [vmem:[#allocation5 + $0x568] sm:$0xff]  ;;  %v222_v7 = vld [vmem:[#allocation5 + $0x578] sm:$0xff] }
  0x83   :  { %579 = vmatpush1.bf16.xpose.msra.mxu0 %v578_v20  ;;  %v668_v20 = vpack.c.bf16 %v186_v18, %v184_v17  ;;  %v708_v18 = vpack.c.bf16 %v226_v16, %v224_v15 }
  0x84   :  { %643 = vmatpush1.bf16.xpose.msra.mxu1 %v642_v21  ;;  %581 = vmatprep.subr.bf16.mxu0 %v580_v22  ;;  %v183_v21 = vld [vmem:[#allocation5 + $0x440] sm:$0xff]  ;;  %v185_v22 = vld [vmem:[#allocation5 + $0x450] sm:$0xff] }
  0x85   :  { %645 = vmatprep.subr.bf16.mxu1 %v644_v23  ;;  %v188_v23 = vld [vmem:[#allocation5 + $0x468] sm:$0xff]  ;;  %v670_v25 = vpack.c.bf16 %v185_v22, %v183_v21  ;;  %v230_v22 = vld [vmem:[#allocation5 + $0x5b8] sm:$0xff] }
  0x86   :  { %v672_v26 = vpack.c.bf16 %v190_v24, %v188_v23  ;;  %v228_v21 = vld [vmem:[#allocation5 + $0x5a8] sm:$0xff] }
  0x87   :  { %v712_v24 = vpack.c.bf16 %v230_v22, %v228_v21 }
  0x8b   :  { %583 = vmatpush1.bf16.xpose.msra.mxu0 %v582_v32  ;;  %v191_v32 = vld [vmem:[#allocation5 + $0x480] sm:$0xff] }
  0x8c   :  { %647 = vmatpush1.bf16.xpose.msra.mxu1 %v646_v33  ;;  %585 = vmatprep.subr.bf16.mxu0 %v584_v34  ;;  %v193_v33 = vld [vmem:[#allocation5 + $0x490] sm:$0xff]  ;;  %v196_v34 = vld [vmem:[#allocation5 + $0x4a8] sm:$0xff] }
  0x8d   :  { %649 = vmatprep.subr.bf16.mxu1 %v648_v35  ;;  %v198_v35 = vld [vmem:[#allocation5 + $0x4b8] sm:$0xff]  ;;  %v678_v36 = vpack.c.bf16 %v193_v33, %v191_v32  ;;  %v236_v32 = vld [vmem:[#allocation5 + $0x5e8] sm:$0xff] }
  0x8e   :  { %v680_v37 = vpack.c.bf16 %v198_v35, %v196_v34  ;;  %v238_v33 = vld [vmem:[#allocation5 + $0x5f8] sm:$0xff] }
  0x8f   :  { %v720_v35 = vpack.c.bf16 %v238_v33, %v236_v32 }
  0x93   :  { %587 = vmatpush1.bf16.xpose.msra.mxu0 %v586_v44  ;;  %v199_v44 = vld [vmem:[#allocation5 + $0x4c0] sm:$0xff] }
  0x94   :  { %651 = vmatpush1.bf16.xpose.msra.mxu1 %v650_v45  ;;  %589 = vmatprep.subr.bf16.mxu0 %v588_v46  ;;  %v201_v45 = vld [vmem:[#allocation5 + $0x4d0] sm:$0xff]  ;;  %v204_v46 = vld [vmem:[#allocation5 + $0x4e8] sm:$0xff] }
  0x95   :  { %653 = vmatprep.subr.bf16.mxu1 %v652_v47  ;;  %v206_v47 = vld [vmem:[#allocation5 + $0x4f8] sm:$0xff]  ;;  %v686_v48 = vpack.c.bf16 %v201_v45, %v199_v44  ;;  %v247_v44 = vsub.s32 1, %v242_v40  ;;  %v255_v45 = vsub.s32 3, %v242_v40 }
  0x96   :  { %v688_v49 = vpack.c.bf16 %v206_v47, %v204_v46 }
  0x9b   :  { %591 = vmatpush1.bf16.xpose.msra.mxu0 %v590_v56  ;;  %v207_v56 = vld [vmem:[#allocation5 + $0x500] sm:$0xff] }
  0x9c   :  { %655 = vmatpush1.bf16.xpose.msra.mxu1 %v654_v57  ;;  %593 = vmatprep.subr.bf16.mxu0 %v592_v58  ;;  %v209_v57 = vld [vmem:[#allocation5 + $0x510] sm:$0xff]  ;;  %v212_v58 = vld [vmem:[#allocation5 + $0x528] sm:$0xff] }
  0x9d   :  { %657 = vmatprep.subr.bf16.mxu1 %v656_v59  ;;  %v214_v59 = vld [vmem:[#allocation5 + $0x538] sm:$0xff]  ;;  %v694_v60 = vpack.c.bf16 %v209_v57, %v207_v56 }
  0x9e   :  { %v696_v61 = vpack.c.bf16 %v214_v59, %v212_v58 }
  0xa3   :  { %595 = vmatpush1.bf16.xpose.msra.mxu0 %v594_v2  ;;  %v698_v2 = vpack.c.bf16 %v213_v63, %v211_v62 }
  0xa4   :  { %659 = vmatpush1.bf16.xpose.msra.mxu1 %v658_v3  ;;  %661 = vmatprep.subr.bf16.mxu0 %v660_v4  ;;  %v700_v3 = vpack.c.bf16 %v218_v1, %v216_v0  ;;  %v259_v0 = vsub.s32 4, %v242_v40  ;;  %v263_v1 = vsub.s32 5, %v242_v40 }
  0xa5   :  { %724 = vmatprep.subr.bf16.mxu1 %v660_v4  ;;  %v215_v4 = vld [vmem:[#allocation5 + $0x540] sm:$0xff] }
  0xa6   :  { %v702_v8 = vpack.c.bf16 %v217_v5, %v215_v4 }
  0xaa   :  { %336 = vmatmul.mubr.f32.vlgmr.msra.gmra.mrb[0].mxu0 %v890_v9 }
  0xab   :  { %413 = vmatmul.mubr.f32.vlgmr.msra.gmra.mrb[0].mxu1 %v890_v9  ;;  %663 = vmatpush1.bf16.xpose.msra.mxu0 %v662_v10 }
  0xac   :  { %740 = vmatpush1.bf16.xpose.msra.mxu1 %v662_v10  ;;  %665 = vmatprep.subr.bf16.mxu0 %v664_v11  ;;  %v704_v10 = vpack.c.bf16 %v222_v7, %v220_v6 }
  0xad   :  { %725 = vmatprep.subr.bf16.mxu1 %v664_v11  ;;  %341 = vmatprep.mubr.f32.mxu0 %v46_v12  ;;  %v219_v11 = vld [vmem:[#allocation5 + $0x560] sm:$0xff] }
  0xae   :  { %418 = vmatprep.mubr.f32.mxu1 %v46_v12  ;;  %342 = vmatmul.mubr.f32.gmra.mrb[2].mxu0 %v894_v13 }
  0xaf   :  { %419 = vmatmul.mubr.f32.gmra.mrb[2].mxu1 %v894_v13  ;;  %489 = vmatprep.mubr.f32.mxu0 %v886_v14  ;;  %v194_v14 = vld [vmem:[#allocation5 + $0x498] sm:$0xff] }
  0xb0   :  { %495 = vmatprep.mubr.f32.mxu1 %v46_v12  ;;  %v676_v31 = vpack.c.bf16 %v194_v14, %v192_v29  ;;  %v221_v12 = vld [vmem:[#allocation5 + $0x570] sm:$0xff]  ;;  %v716_v14 = vpack.c.bf16 %v234_v28, %v232_v27 }
  0xb1   :  { %v706_v17 = vpack.c.bf16 %v221_v12, %v219_v11 }
  0xb3   :  { %667 = vmatpush1.bf16.xpose.msra.mxu0 %v666_v19 }
  0xb4   :  { %741 = vmatpush1.bf16.xpose.msra.mxu1 %v666_v19  ;;  %669 = vmatprep.subr.bf16.mxu0 %v668_v20  ;;  %v223_v19 = vld [vmem:[#allocation5 + $0x580] sm:$0xff] }
  0xb5   :  { %726 = vmatprep.subr.bf16.mxu1 %v668_v20  ;;  %v225_v20 = vld [vmem:[#allocation5 + $0x590] sm:$0xff] }
  0xb6   :  { %v710_v23 = vpack.c.bf16 %v225_v20, %v223_v19 }
  0xbb   :  { %671 = vmatpush1.bf16.xpose.msra.mxu0 %v670_v25 }
  0xbc   :  { %742 = vmatpush1.bf16.xpose.msra.mxu1 %v670_v25  ;;  %673 = vmatprep.subr.bf16.mxu0 %v672_v26  ;;  %v227_v25 = vld [vmem:[#allocation5 + $0x5a0] sm:$0xff] }
  0xbd   :  { %727 = vmatprep.subr.bf16.mxu1 %v672_v26  ;;  %v229_v26 = vld [vmem:[#allocation5 + $0x5b0] sm:$0xff] }
  0xbe   :  { %v714_v29 = vpack.c.bf16 %v229_v26, %v227_v25 }
  0xc3   :  { %675 = vmatpush1.bf16.xpose.msra.mxu0 %v674_v30 }
  0xc4   :  { %743 = vmatpush1.bf16.xpose.msra.mxu1 %v674_v30  ;;  %677 = vmatprep.subr.bf16.mxu0 %v676_v31  ;;  %v231_v30 = vld [vmem:[#allocation5 + $0x5c0] sm:$0xff] }
  0xc5   :  { %728 = vmatprep.subr.bf16.mxu1 %v676_v31  ;;  %v233_v31 = vld [vmem:[#allocation5 + $0x5d0] sm:$0xff] }
  0xc6   :  { %v718_v34 = vpack.c.bf16 %v233_v31, %v231_v30 }
  0xcb   :  { %679 = vmatpush1.bf16.xpose.msra.mxu0 %v678_v36 }
  0xcc   :  { %744 = vmatpush1.bf16.xpose.msra.mxu1 %v678_v36  ;;  %681 = vmatprep.subr.bf16.mxu0 %v680_v37  ;;  %v235_v36 = vld [vmem:[#allocation5 + $0x5e0] sm:$0xff] }
  0xcd   :  { %729 = vmatprep.subr.bf16.mxu1 %v680_v37  ;;  %v237_v37 = vld [vmem:[#allocation5 + $0x5f0] sm:$0xff] }
  0xce   :  { %v722_v38 = vpack.c.bf16 %v237_v37, %v235_v36 }
  0xd3   :  { %683 = vmatpush1.bf16.xpose.msra.mxu0 %v682_v42 }
  0xd4   :  { %745 = vmatpush1.bf16.xpose.msra.mxu1 %v682_v42  ;;  %685 = vmatprep.subr.bf16.mxu0 %v684_v43  ;;  %v239_v42 = vld [vmem:[%s918_s2] sm:$0x3f]  ;;  %s839_s2 = smov [#allocation7]  }
  0xd5   :  { %730 = vmatprep.subr.bf16.mxu1 %v684_v43  ;;  %v251_v43 = vsub.s32 2, %v242_v40  ;;  %v244_v46 = vrot.slane %v239_v42, %v243_v41  ;;  %s519_s11 = sshll.u32 %s839_s2, 4  ;;  %s520_s11 = int_to_ptr.vmem [resolvable:$true] %s519_s11 }
  0xd6   :  { %s807_s12 = scalar_lea.vmem %s520_s11, 1536  ;;  %p812_p3 = scmp.lt.s32.totalorder %s520_s11, %s520_s11 }
  0xd7   :  { %v252_v47 = vrot.slane %v239_v42, %v251_v43  ;;  %p808_p2 = scmp.ne.s32.totalorder %s520_s11, %s807_s12  ;;  %p813_p4 = scmp.lt.s32.totalorder %s807_s12, %s807_s12 }
  0xd9   :  { %p814_p5 = por %p813_p4, %p812_p3 }
  0xdb   :  { %687 = vmatpush1.bf16.xpose.msra.mxu0 %v686_v48  ;;  %p815_p6 = pnand %p814_p5, %p808_p2 }
  0xdc   :  { %746 = vmatpush1.bf16.xpose.msra.mxu1 %v686_v48  ;;  %689 = vmatprep.subr.bf16.mxu0 %v688_v49  ;;  %v248_v48 = vrot.slane %v239_v42, %v247_v44 }
  0xdd   :  { %731 = vmatprep.subr.bf16.mxu1 %v688_v49  ;;  %v256_v49 = vrot.slane %v239_v42, %v255_v45 }
  0xe3   :  { %691 = vmatpush1.bf16.xpose.msra.mxu0 %v690_v54 }
  0xe4   :  { %747 = vmatpush1.bf16.xpose.msra.mxu1 %v690_v54  ;;  %693 = vmatprep.subr.bf16.mxu0 %v692_v55 }
  0xe5   :  { %732 = vmatprep.subr.bf16.mxu1 %v692_v55 }
  0xeb   :  { %695 = vmatpush1.bf16.xpose.msra.mxu0 %v694_v60 }
  0xec   :  { %748 = vmatpush1.bf16.xpose.msra.mxu1 %v694_v60  ;;  %697 = vmatprep.subr.bf16.mxu0 %v696_v61 }
  0xed   :  { %733 = vmatprep.subr.bf16.mxu1 %v696_v61 }
  0xf3   :  { %699 = vmatpush1.bf16.xpose.msra.mxu0 %v698_v2 }
  0xf4   :  { %749 = vmatpush1.bf16.xpose.msra.mxu1 %v698_v2  ;;  %701 = vmatprep.subr.bf16.mxu0 %v700_v3  ;;  %v260_v2 = vrot.slane %v239_v42, %v259_v0 }
  0xf5   :  { %734 = vmatprep.subr.bf16.mxu1 %v700_v3  ;;  %v264_v3 = vrot.slane %v239_v42, %v263_v1 }
  0xfb   :  { %703 = vmatpush1.bf16.xpose.msra.mxu0 %v702_v8 }
  0xfc   :  { %750 = vmatpush1.bf16.xpose.msra.mxu1 %v702_v8  ;;  %705 = vmatprep.subr.bf16.mxu0 %v704_v10 }
  0xfd   :  { %735 = vmatprep.subr.bf16.mxu1 %v704_v10 }
 0x103   :  { %707 = vmatpush1.bf16.xpose.msra.mxu0 %v706_v17 }
 0x104   :  { %751 = vmatpush1.bf16.xpose.msra.mxu1 %v706_v17  ;;  %709 = vmatprep.subr.bf16.mxu0 %v708_v18 }
 0x105   :  { %736 = vmatprep.subr.bf16.mxu1 %v708_v18 }
 0x10b   :  { %711 = vmatpush1.bf16.xpose.msra.mxu0 %v710_v23 }
 0x10c   :  { %752 = vmatpush1.bf16.xpose.msra.mxu1 %v710_v23  ;;  %713 = vmatprep.subr.bf16.mxu0 %v712_v24 }
 0x10d   :  { %737 = vmatprep.subr.bf16.mxu1 %v712_v24 }
 0x113   :  { %715 = vmatpush1.bf16.xpose.msra.mxu0 %v714_v29 }
 0x114   :  { %753 = vmatpush1.bf16.xpose.msra.mxu1 %v714_v29  ;;  %717 = vmatprep.subr.bf16.mxu0 %v716_v14 }
 0x115   :  { %738 = vmatprep.subr.bf16.mxu1 %v716_v14 }
 0x11b   :  { %719 = vmatpush1.bf16.xpose.msra.mxu0 %v718_v34 }
 0x11c   :  { %754 = vmatpush1.bf16.xpose.msra.mxu1 %v718_v34  ;;  %721 = vmatprep.subr.bf16.mxu0 %v720_v35 }
 0x11d   :  { %739 = vmatprep.subr.bf16.mxu1 %v720_v35 }
 0x123   :  { %723 = vmatpush1.bf16.xpose.msra.mxu0 %v722_v38 }
 0x124   :  { %755 = vmatpush1.bf16.xpose.msra.mxu1 %v722_v38 }
 0x12a   :  { %490 = vmatmul.mubr.f32.vlgmr.msra.gmra.mrb[4].mxu0 %v890_v9 }
 0x12b   :  { %496 = vmatmul.mubr.f32.vlgmr.msra.gmra.mrb[4].mxu1 %v894_v13 }
 0x17d   :  { %v337_v50 = vpop.f32.mrb[0].mxu0 }
 0x17e   :  { %v338_v51 = vadd.f32 %v337_v50, %v244_v46  ;;  %v414_v52 = vpop.f32.mrb[0].mxu1  ;;  %v339_v9 = vpop.f32.mrb[1].mxu0 }
 0x17f   :  { %v415_v53 = vadd.f32 %v414_v52, %v252_v47  ;;  %v340_v13 = vadd.f32 %v339_v9, %v248_v48  ;;  %v416_v54 = vpop.f32.mrb[1].mxu1 }
 0x180   :  { %502 = vst [vmem:[#allocation7] sm:$0xff] %v338_v51  ;;  %v417_v55 = vadd.f32 %v416_v54, %v256_v49 }
 0x181   :  { %504 = vst [vmem:[#allocation7 + $0x10] sm:$0xff] %v415_v53  ;;  %503 = vst [vmem:[#allocation7 + $0x8] sm:$0xff] %v340_v13  ;;  %v343_v56 = vpop.f32.mrb[2].mxu0 }
 0x182   :  { %505 = vst [vmem:[#allocation7 + $0x18] sm:$0xff] %v417_v55  ;;  %v344_v57 = vadd.f32 %v343_v56, %v244_v46  ;;  %v420_v58 = vpop.f32.mrb[2].mxu1  ;;  %v345_v59 = vpop.f32.mrb[3].mxu0 }
 0x183   :  { %v421_v60 = vadd.f32 %v420_v58, %v252_v47  ;;  %v346_v61 = vadd.f32 %v345_v59, %v248_v48  ;;  %v422_v62 = vpop.f32.mrb[3].mxu1 }
 0x184   :  { %508 = vst [vmem:[#allocation7 + $0x30] sm:$0xff] %v344_v57  ;;  %v423_v63 = vadd.f32 %v422_v62, %v256_v49 }
 0x185   :  { %510 = vst [vmem:[#allocation7 + $0x40] sm:$0xff] %v421_v60  ;;  %509 = vst [vmem:[#allocation7 + $0x38] sm:$0xff] %v346_v61 }
 0x186   :  { %511 = vst [vmem:[#allocation7 + $0x48] sm:$0xff] %v423_v63 }
 0x1fd   :  { %v491_v4 = vpop.f32.mrb[4].mxu0 }
 0x1fe   :  { %v492_v5 = vadd.f32 %v491_v4, %v260_v2  ;;  %v497_v6 = vpop.f32.mrb[4].mxu1  ;;  %v493_v7 = vpop.f32.mrb[5].mxu0 }
 0x1ff   :  { %v498_v8 = vadd.f32 %v497_v6, %v260_v2  ;;  %v494_v10 = vadd.f32 %v493_v7, %v264_v3  ;;  %v499_v11 = vpop.f32.mrb[5].mxu1 }
 0x200   :  { %506 = vst [vmem:[#allocation7 + $0x20] sm:$0xff] %v492_v5  ;;  %v500_v12 = vadd.f32 %v499_v11, %v264_v3 }
 0x201   :  { %512 = vst [vmem:[#allocation7 + $0x50] sm:$0xff] %v498_v8  ;;  %507 = vst [vmem:[#allocation7 + $0x28] sm:$0xff] %v494_v10 }
 0x202   :  { %513 = vst [vmem:[#allocation7 + $0x58] sm:$0xff] %v500_v12 }
 0x203   :  { %818 = shalt.err (!%p815_p6)
}
 0x204   :  { %s819_s15 = scalar_lea.hbm %s919_s3, 1536 }
 0x205   :  { %p820_p7 = scmp.ne.s32.totalorder %s919_s3, %s819_s15  ;;  %p823_p8 = scmp.lt.u32.totalorder %s819_s15, %s919_s3 }
 0x207   :  { %p825_p9 = pnand %p823_p8, %p820_p7 }
 0x209   :  { %828 = shalt.err (!%p825_p9)
}
 0x20a   :  { %s840_s20 = smov 768   ;;  %s841_s21 = smov 48  }
 0x20b   :  { %525 = dma.vmem_to_hbm [thread:$0]  %s520_s11, 1536, %s919_s3, [#allocation4], %s840_s20, %s840_s20, %s841_s21  }
 0x20c   :  { %833 = dma.done.wait [#allocation4], 1536  }
 0x20d   :  { %834 = vsyncadd [#allocation4], 4294965760 }
 0x20e   :  { %529 = vsyncpa [#allocation3], 1 }
 0x20f   :  { %530 = vsyncpa [#allocation6], 1 }
 0x210   :  { %531 = vsyncpa [#allocation4], 1 }

</bundles_post_ra>
